<compile_context>
chip_gen: v7x
topology: tpu7x:2x2x1
jax: 0.10.0
libtpu: 0.0.40
codegen_flags: <defaults>
</compile_context>

<pallas_src>
import functools

import jax
import jax.numpy as jnp
from jax.experimental import pallas as pl
from jax.experimental.pallas import tpu as pltpu


# ---------------------------------------------------------------------------
# Generation-aware sizing helpers
# ---------------------------------------------------------------------------

def _vmem_params():
    """Returns (per-buffer tile budget bytes, scoped-VMEM limit bytes)."""
    mib = 1024 * 1024
    cap = None
    try:
        cap = int(getattr(pltpu.get_tpu_info(), "vmem_capacity_bytes", 0)) or None
    except Exception:
        cap = None
    if cap is None:
        return 2 * mib, 32 * mib                 # conservative: fits every gen
    if cap >= 96 * mib:                          # v5e / v6e: 128 MiB VMEM
        return 4 * mib, 80 * mib
    if cap >= 48 * mib:                          # v7x: 64 MiB VMEM per TC
        return 2 * mib, 36 * mib
    return 1 * mib, max(8 * mib, cap // 2)       # unknown / small-VMEM part


def _pad8(n):
    return -(-n // 8) * 8


def _pad128(n):
    return -(-n // 128) * 128


# ---------------------------------------------------------------------------
# Kernels
# ---------------------------------------------------------------------------

def _norm_kernel_3d(x_ref, o_ref, *, eps):
    # x_ref / o_ref: (tb, W, tf) blocks; the whole window axis is resident, so
    # the reduction is a single pass over the second-minor axis.
    x = x_ref[...].astype(jnp.float32)
    w = x.shape[1]
    mean = jnp.mean(x, axis=1, keepdims=True)                       # (tb,1,tf)
    d = x - mean                                                    # only full-tile f32 kept live
    var = jnp.sum(d * d, axis=1, keepdims=True) / jnp.float32(w - 1)  # ddof=1
    inv = pl.reciprocal(jnp.sqrt(var) + eps, approx=False)          # tf recips, not W*tf divides
    o_ref[...] = (d * inv).astype(o_ref.dtype)


def _norm_kernel_flat(x_ref, o_ref, *, w, f, eps):
    # x_ref / o_ref: (tb, W*F) lane-dense blocks (contiguous HBM chunks, dense
    # vector stores).  One in-VMEM relayout to (tb, W, F) for the window
    # reduction; the relayout cost hides under the HBM DMA.
    tb = x_ref.shape[0]
    x = x_ref[...].astype(jnp.float32).reshape(tb, w, f)
    mean = jnp.mean(x, axis=1, keepdims=True)
    d = x - mean
    var = jnp.sum(d * d, axis=1, keepdims=True) / jnp.float32(w - 1)
    inv = pl.reciprocal(jnp.sqrt(var) + eps, approx=False)
    o_ref[...] = (d * inv).astype(o_ref.dtype).reshape(tb, w * f)


def _stats_kernel(x_ref, mean_ref, inv_ref, sum_acc, sq_acc, *, w_total, tw, eps):
    # Pass 1 of the large-W fallback: accumulate sum / sum-of-squares over the
    # W grid axis (innermost, "arbitrary"); finalize mean and 1/(std+eps).
    wi = pl.program_id(2)

    @pl.when(wi == 0)
    def _init():
        sum_acc[...] = jnp.zeros_like(sum_acc)
        sq_acc[...] = jnp.zeros_like(sq_acc)

    x = x_ref[...].astype(jnp.float32)                               # (1, tw, tf)
    pos = wi * tw + jax.lax.broadcasted_iota(jnp.int32, x.shape, 1)
    x = jnp.where(pos < w_total, x, 0.0)                             # mask W remainder
    sum_acc[...] += jnp.sum(x, axis=1, keepdims=True)
    sq_acc[...] += jnp.sum(x * x, axis=1, keepdims=True)

    @pl.when(wi == pl.num_programs(2) - 1)
    def _finalize():
        n = jnp.float32(w_total)
        mean = sum_acc[...] / n
        # Streaming form E[x^2] - mean^2; clamp tiny negative rounding noise.
        var = jnp.maximum(sq_acc[...] - n * mean * mean, 0.0) / jnp.float32(w_total - 1)
        mean_ref[...] = mean
        inv_ref[...] = pl.reciprocal(jnp.sqrt(var) + eps, approx=False)


def _apply_kernel(x_ref, mean_ref, inv_ref, o_ref):
    # Pass 2 of the large-W fallback: plain elementwise normalize.
    x = x_ref[...].astype(jnp.float32)
    o_ref[...] = ((x - mean_ref[...]) * inv_ref[...]).astype(o_ref.dtype)


# ---------------------------------------------------------------------------
# Launchers
# ---------------------------------------------------------------------------

def _run_3d(x, eps, budget, vmem_limit, usable):
    """Blocks of (tb, W, tf) on the native (B, W, F) layout."""
    B, W, F = x.shape
    isz = jnp.dtype(x.dtype).itemsize
    budget_elems = max(1, budget // isz)
    lane_dense = (F % 128 == 0)

    # Feature tile: the full row whenever it fits (single contiguous DMA chunk
    # per block), otherwise the largest 128-multiple that does.
    if lane_dense and W * F * isz > budget:
        tf = min(F, max(128, (budget_elems // W) // 128 * 128))
    else:
        tf = F

    # Batch tile from the HBM-side budget, clamped by the f32 working set
    # (padded (8,128) VMEM layout; ~3 full-tile f32 temporaries).
    tb = min(B, max(1, budget_elems // (W * tf)))
    per_block = _pad8(W) * _pad128(tf)
    tb = min(tb, max(1, usable // ((4 * isz + 12) * per_block)))

    # Make sure there are enough grid steps for megacore sharding + pipelining.
    def steps(tb_, tf_):
        return pl.cdiv(B, tb_) * pl.cdiv(F, tf_)

    while steps(tb, tf) < 8 and tb > 1:
        tb = max(1, tb // 2)
    while lane_dense and steps(tb, tf) < 8 and tf > 128:
        tf = max(128, (tf // 2) // 128 * 128)

    grid = (pl.cdiv(B, tb), pl.cdiv(F, tf))
    kernel = functools.partial(_norm_kernel_3d, eps=eps)
    return pl.pallas_call(
        kernel,
        out_shape=jax.ShapeDtypeStruct((B, W, F), x.dtype),
        grid_spec=pltpu.PrefetchScalarGridSpec(
            num_scalar_prefetch=0,
            grid=grid,
            in_specs=[pl.BlockSpec((tb, W, tf), lambda i, j: (i, 0, j))],
            out_specs=pl.BlockSpec((tb, W, tf), lambda i, j: (i, 0, j)),
        ),
        compiler_params=pltpu.CompilerParams(
            dimension_semantics=("parallel", "parallel"),
            vmem_limit_bytes=vmem_limit,
        ),
    )(x)


def _run_flat(x, eps, budget, vmem_limit, usable):
    """Lane-dense blocks of (tb, W*F) on a free (B, W*F) view (small-F path)."""
    B, W, F = x.shape
    R = W * F
    isz = jnp.dtype(x.dtype).itemsize
    budget_elems = max(1, budget // isz)
    per_row = _pad128(R)

    tb = min(B, max(1, budget_elems // R))
    tb = min(tb, max(1, usable // ((4 * isz + 16) * per_row)))
    if tb < B:
        tb = max(8, (tb // 8) * 8)        # 2-D block: sublane dim must be 8k or full B
        if tb >= B:
            tb = B
    if tb == B and B > 8:
        tb = max(8, (tb // 8) * 8)        # leave >= 2 steps when B allows it

    def steps(t):
        return pl.cdiv(B, t)

    while steps(tb) < 8 and tb > 8:
        new = max(8, ((tb // 2) // 8) * 8)
        if new == tb:
            break
        tb = new

    grid = (pl.cdiv(B, tb),)
    xf = x.reshape(B, R)                  # free: W and F are contiguous in HBM
    kernel = functools.partial(_norm_kernel_flat, w=W, f=F, eps=eps)
    out = pl.pallas_call(
        kernel,
        out_shape=jax.ShapeDtypeStruct((B, R), x.dtype),
        grid_spec=pltpu.PrefetchScalarGridSpec(
            num_scalar_prefetch=0,
            grid=grid,
            in_specs=[pl.BlockSpec((tb, R), lambda i: (i, 0))],
            out_specs=pl.BlockSpec((tb, R), lambda i: (i, 0)),
        ),
        compiler_params=pltpu.CompilerParams(
            dimension_semantics=("parallel",),
            vmem_limit_bytes=vmem_limit,
        ),
    )(xf)
    return out.reshape(B, W, F)


def _run_two_pass(x, eps, budget, vmem_limit, usable):
    """Large-W fallback: stats pass (W axis 'arbitrary') + normalize pass."""
    B, W, F = x.shape
    isz = jnp.dtype(x.dtype).itemsize
    budget_elems = max(1, budget // isz)

    tf = min(F, 512) if F % 128 == 0 else F
    tw = max(8, (budget_elems // tf) // 8 * 8)
    tw = min(tw, max(8, (usable // ((2 * isz + 12) * _pad128(tf))) // 8 * 8))
    if tw >= W:
        tw = W

    # Pass 1: mean and 1/(std+eps), both f32, shape (B, 1, F).
    grid1 = (B, pl.cdiv(F, tf), pl.cdiv(W, tw))
    stats = functools.partial(_stats_kernel, w_total=W, tw=tw, eps=eps)
    mean, inv = pl.pallas_call(
        stats,
        out_shape=(jax.ShapeDtypeStruct((B, 1, F), jnp.float32),
                   jax.ShapeDtypeStruct((B, 1, F), jnp.float32)),
        grid_spec=pltpu.PrefetchScalarGridSpec(
            num_scalar_prefetch=0,
            grid=grid1,
            in_specs=[pl.BlockSpec((1, tw, tf), lambda b, f, w: (b, w, f))],
            out_specs=[pl.BlockSpec((1, 1, tf), lambda b, f, w: (b, 0, f)),
                       pl.BlockSpec((1, 1, tf), lambda b, f, w: (b, 0, f))],
            scratch_shapes=[pltpu.VMEM((1, 1, tf), jnp.float32),
                            pltpu.VMEM((1, 1, tf), jnp.float32)],
        ),
        compiler_params=pltpu.CompilerParams(
            dimension_semantics=("parallel", "parallel", "arbitrary"),
            vmem_limit_bytes=vmem_limit,
        ),
    )(x)

    # Pass 2: elementwise normalize (all axes independent).
    grid2 = (B, pl.cdiv(W, tw), pl.cdiv(F, tf))
    return pl.pallas_call(
        _apply_kernel,
        out_shape=jax.ShapeDtypeStruct((B, W, F), x.dtype),
        grid_spec=pltpu.PrefetchScalarGridSpec(
            num_scalar_prefetch=0,
            grid=grid2,
            in_specs=[pl.BlockSpec((1, tw, tf), lambda b, w, f: (b, w, f)),
                      pl.BlockSpec((1, 1, tf), lambda b, w, f: (b, 0, f)),
                      pl.BlockSpec((1, 1, tf), lambda b, w, f: (b, 0, f))],
            out_specs=pl.BlockSpec((1, tw, tf), lambda b, w, f: (b, w, f)),
        ),
        compiler_params=pltpu.CompilerParams(
            dimension_semantics=("parallel", "parallel", "parallel"),
            vmem_limit_bytes=vmem_limit,
        ),
    )(x, mean, inv)


# ---------------------------------------------------------------------------
# Public entry point
# ---------------------------------------------------------------------------

def normalize_over_window(x, eps=1e-8, *, force_two_pass=False):
    """(B, W, F) -> (B, W, F), normalized over axis 1 (window).

    Matches torch: (x - mean) / (std_ddof1 + eps).  W == 1 yields NaN, exactly
    like torch.std with its default unbiased estimator.
    """
    if x.ndim != 3:
        raise ValueError(f"expected (batch, window, features), got {x.shape}")
    B, W, F = x.shape
    isz = jnp.dtype(x.dtype).itemsize
    budget, vmem_limit = _vmem_params()
    usable = int(vmem_limit * 0.8)

    if not force_two_pass:
        if F % 128 == 0:
            # Natively lane-dense: single pass if the smallest legal tile fits.
            if _pad8(W) * 128 * (4 * isz + 12) <= usable:
                return _run_3d(x, eps, budget, vmem_limit, usable)
        else:
            flat_min = _pad8(min(B, 8)) * _pad128(W * F) * (4 * isz + 16)
            d3_min = _pad8(W) * _pad128(F) * (4 * isz + 12)
            if flat_min <= usable:
                try:
                    out = _run_flat(x, eps, budget, vmem_limit, usable)
                    return jax.block_until_ready(out)
                except Exception:
                    # The in-kernel (TB, W*F) <-> (TB, W, F) relayout is not
                    # supported by this Mosaic build; use 3-D blocks instead.
                    pass
            if d3_min <= usable:
                return _run_3d(x, eps, budget, vmem_limit, usable)

    # Window too large for a full-window-resident tile (or explicitly forced).
    return _run_two_pass(x, eps, budget, vmem_limit, usable)


def _reference(x, eps=1e-8):
    x = x.astype(jnp.float32)
    mean = jnp.mean(x, axis=1, keepdims=True)
    std = jnp.std(x, axis=1, keepdims=True, ddof=1)
    return (x - mean) / (std + eps)


if __name__ == "__main__":
    # Shapes implied by the module: (batch, window, features).
    key = jax.random.PRNGKey(0)
    B, W, F = 2, 8, 32
    x = jax.random.normal(key, (B, W, F), dtype=jnp.float32)
    out = jax.block_until_ready(normalize_over_window(x))
    assert out.shape == (B, W, F)
    assert jnp.allclose(out, _reference(x), atol=1e-5, rtol=1e-5), "mismatch (small-F path)"

    # Lane-dense (F % 128 == 0) path with several batch tiles / grid steps.
    x2 = jax.random.normal(jax.random.PRNGKey(1), (32, 16, 128), dtype=jnp.float32)
    out2 = jax.block_until_ready(normalize_over_window(x2))
    assert jnp.allclose(out2, _reference(x2), atol=1e-5, rtol=1e-5), "mismatch (F=128 path)"

    # Small-F path with multiple batch tiles (exercises the flat blocks + grid split).
    x3 = jax.random.normal(jax.random.PRNGKey(2), (64, 32, 48), dtype=jnp.float32)
    out3 = jax.block_until_ready(normalize_over_window(x3))
    assert jnp.allclose(out3, _reference(x3), atol=1e-5, rtol=1e-5), "mismatch (flat path)"

    # Forced two-pass (large-W fallback) correctness check.
    x4 = jax.random.normal(jax.random.PRNGKey(3), (4, 72, 32), dtype=jnp.float32)
    out4 = jax.block_until_ready(normalize_over_window(x4, force_two_pass=True))
    assert jnp.allclose(out4, _reference(x4), atol=1e-4, rtol=1e-4), "mismatch (two-pass path)"

    print("KERNEL_OK")
</pallas_src>

<mosaic_0001>
module attributes {stable_mosaic.version = 11 : i64} {
  func.func @_norm_kernel_flat(%arg0: i32, %arg1: memref<2x256xf32, #tpu.memory_space<vmem>>, %arg2: memref<2x256xf32, #tpu.memory_space<vmem>>) attributes {dimension_semantics = [#tpu.dimension_semantics<parallel>], iteration_bounds = array<i64: 1>, scalar_prefetch = 0 : i64, scratch_operands = 0 : i64, tpu.core_type = #tpu.core_type<tc>, window_params = [{transform_indices = @transform_0, window_bounds = array<i64: 2, 256>}, {transform_indices = @transform_1, window_bounds = array<i64: 2, 256>}]} {
    %c0 = arith.constant 0 : index
    %c0_0 = arith.constant 0 : index
    %0 = vector.load %arg1[%c0, %c0_0] : memref<2x256xf32, #tpu.memory_space<vmem>>, vector<2x256xf32>
    %1 = vector.shape_cast %0 : vector<2x256xf32> to vector<2x8x32xf32>
    %cst = arith.constant dense<0.000000e+00> : vector<2x32xf32>
    %2 = vector.multi_reduction <add>, %1, %cst [1] : vector<2x8x32xf32> to vector<2x32xf32>
    %3 = vector.shape_cast %2 : vector<2x32xf32> to vector<2x1x32xf32>
    %cst_1 = arith.constant 8.000000e+00 : f32
    %4 = vector.broadcast %cst_1 : f32 to vector<2x1x32xf32>
    %5 = arith.divf %3, %4 : vector<2x1x32xf32>
    %6 = vector.broadcast %5 : vector<2x1x32xf32> to vector<2x8x32xf32>
    %7 = arith.subf %1, %6 : vector<2x8x32xf32>
    %8 = arith.mulf %7, %7 : vector<2x8x32xf32>
    %cst_2 = arith.constant dense<0.000000e+00> : vector<2x32xf32>
    %9 = vector.multi_reduction <add>, %8, %cst_2 [1] : vector<2x8x32xf32> to vector<2x32xf32>
    %10 = vector.shape_cast %9 : vector<2x32xf32> to vector<2x1x32xf32>
    %cst_3 = arith.constant 7.000000e+00 : f32
    %11 = vector.broadcast %cst_3 : f32 to vector<2x1x32xf32>
    %12 = arith.divf %10, %11 : vector<2x1x32xf32>
    %13 = math.sqrt %12 : vector<2x1x32xf32>
    %cst_4 = arith.constant 9.99999993E-9 : f32
    %14 = vector.broadcast %cst_4 : f32 to vector<2x1x32xf32>
    %15 = arith.addf %13, %14 : vector<2x1x32xf32>
    %16 = tpu.reciprocal %15 : vector<2x1x32xf32> -> vector<2x1x32xf32>
    %17 = vector.broadcast %16 : vector<2x1x32xf32> to vector<2x8x32xf32>
    %18 = arith.mulf %7, %17 : vector<2x8x32xf32>
    %19 = vector.shape_cast %18 : vector<2x8x32xf32> to vector<2x256xf32>
    %c0_5 = arith.constant 0 : index
    %c0_6 = arith.constant 0 : index
    %20 = vector.load %arg2[%c0_5, %c0_6] : memref<2x256xf32, #tpu.memory_space<vmem>>, vector<2x256xf32>
    tpu.vector_store %arg2[%c0_5, %c0_6], %19 {strides = array<i32>} : memref<2x256xf32, #tpu.memory_space<vmem>>, vector<2x256xf32>,
    return
  }
  func.func @transform_0(%arg0: i32) -> (i32, i32) {
    %c0_i32 = arith.constant 0 : i32
    %c0_i32_0 = arith.constant 0 : i32
    return %arg0, %c0_i32 : i32, i32
  }
  func.func @transform_1(%arg0: i32) -> (i32, i32) {
    %c0_i32 = arith.constant 0 : i32
    %c0_i32_0 = arith.constant 0 : i32
    return %arg0, %c0_i32 : i32, i32
  }
}

module attributes {stable_mosaic.version = 11 : i64} {
  func.func @_norm_kernel_3d(%arg0: i32, %arg1: i32, %arg2: memref<1x8x32xf32, #tpu.memory_space<vmem>>, %arg3: memref<1x8x32xf32, #tpu.memory_space<vmem>>) attributes {dimension_semantics = [#tpu.dimension_semantics<parallel>, #tpu.dimension_semantics<parallel>], iteration_bounds = array<i64: 2, 1>, scalar_prefetch = 0 : i64, scratch_operands = 0 : i64, tpu.core_type = #tpu.core_type<tc>, window_params = [{transform_indices = @transform_0, window_bounds = array<i64: 1, 8, 32>}, {transform_indices = @transform_1, window_bounds = array<i64: 1, 8, 32>}]} {
    %c0 = arith.constant 0 : index
    %c0_0 = arith.constant 0 : index
    %c0_1 = arith.constant 0 : index
    %0 = vector.load %arg2[%c0, %c0_0, %c0_1] : memref<1x8x32xf32, #tpu.memory_space<vmem>>, vector<1x8x32xf32>
    %cst = arith.constant dense<0.000000e+00> : vector<1x32xf32>
    %1 = vector.multi_reduction <add>, %0, %cst [1] : vector<1x8x32xf32> to vector<1x32xf32>
    %2 = vector.shape_cast %1 : vector<1x32xf32> to vector<1x1x32xf32>
    %cst_2 = arith.constant 8.000000e+00 : f32
    %3 = vector.broadcast %cst_2 : f32 to vector<1x1x32xf32>
    %4 = arith.divf %2, %3 : vector<1x1x32xf32>
    %5 = vector.broadcast %4 : vector<1x1x32xf32> to vector<1x8x32xf32>
    %6 = arith.subf %0, %5 : vector<1x8x32xf32>
    %7 = arith.mulf %6, %6 : vector<1x8x32xf32>
    %cst_3 = arith.constant dense<0.000000e+00> : vector<1x32xf32>
    %8 = vector.multi_reduction <add>, %7, %cst_3 [1] : vector<1x8x32xf32> to vector<1x32xf32>
    %9 = vector.shape_cast %8 : vector<1x32xf32> to vector<1x1x32xf32>
    %cst_4 = arith.constant 7.000000e+00 : f32
    %10 = vector.broadcast %cst_4 : f32 to vector<1x1x32xf32>
    %11 = arith.divf %9, %10 : vector<1x1x32xf32>
    %12 = math.sqrt %11 : vector<1x1x32xf32>
    %cst_5 = arith.constant 9.99999993E-9 : f32
    %13 = vector.broadcast %cst_5 : f32 to vector<1x1x32xf32>
    %14 = arith.addf %12, %13 : vector<1x1x32xf32>
    %15 = tpu.reciprocal %14 : vector<1x1x32xf32> -> vector<1x1x32xf32>
    %16 = vector.broadcast %15 : vector<1x1x32xf32> to vector<1x8x32xf32>
    %17 = arith.mulf %6, %16 : vector<1x8x32xf32>
    %c0_6 = arith.constant 0 : index
    %c0_7 = arith.constant 0 : index
    %c0_8 = arith.constant 0 : index
    %18 = vector.load %arg3[%c0_6, %c0_7, %c0_8] : memref<1x8x32xf32, #tpu.memory_space<vmem>>, vector<1x8x32xf32>
    tpu.vector_store %arg3[%c0_6, %c0_7, %c0_8], %17 {strides = array<i32>} : memref<1x8x32xf32, #tpu.memory_space<vmem>>, vector<1x8x32xf32>,
    return
  }
  func.func @transform_0(%arg0: i32, %arg1: i32) -> (i32, i32, i32) {
    %c0_i32 = arith.constant 0 : i32
    %c0_i32_0 = arith.constant 0 : i32
    return %arg0, %c0_i32, %arg1 : i32, i32, i32
  }
  func.func @transform_1(%arg0: i32, %arg1: i32) -> (i32, i32, i32) {
    %c0_i32 = arith.constant 0 : i32
    %c0_i32_0 = arith.constant 0 : i32
    return %arg0, %c0_i32, %arg1 : i32, i32, i32
  }
}

</mosaic_0001>

<bundles_post_ra>
// kernel: tpu_custom_call.1
= control target key start
LH: loop header
LB: loop body
LE: loop exit
PB: predicated region body
PF: predicated region fallthrough
CT: control target
= control target key end

     0   :  { %6 = vsyncpa [#allocation3], 0  ;;  %s672_s0 = inlined_call_operand.hbm [shape: f32[2,256], index: 0, kind: input, shape index: {}]   ;;  %s673_s1 = inlined_call_operand.hbm [shape: f32[2,256], index: 1, kind: output, shape index: {}]  }
   0x1   :  { %7 = vsyncpa [#allocation4], 0  ;;  %s533_s6 = smov [#allocation2]   ;;  %s485_s10 = scalar_lea.hbm %s672_s0, 64 }
   0x2   :  { %s14_s7 = sshll.u32 %s533_s6, 4  ;;  %p486_p0 = scmp.ne.s32.totalorder %s672_s0, %s485_s10  ;;  %s15_s7 = int_to_ptr.vmem [resolvable:$true] %s14_s7 }
   0x3   :  { %p489_p1 = scmp.lt.u32.totalorder %s485_s10, %s672_s0 }
   0x5   :  { %p491_p2 = pnand %p489_p1, %p486_p0 }
   0x7   :  { %494 = shalt.err (!%p491_p2)
}
   0x8   :  { %s495_s15 = scalar_lea.vmem %s15_s7, 64  ;;  %p500_p4 = scmp.lt.s32.totalorder %s15_s7, %s15_s7 }
   0x9   :  { %p496_p3 = scmp.ne.s32.totalorder %s15_s7, %s495_s15  ;;  %p501_p5 = scmp.lt.s32.totalorder %s495_s15, %s495_s15 }
   0xb   :  { %p502_p6 = por %p501_p5, %p500_p4 }
   0xd   :  { %p503_p7 = pnand %p502_p6, %p496_p3 }
   0xf   :  { %506 = shalt.err (!%p503_p7)
}
  0x10   :  { %17 = dma.hbm_to_vmem [thread:$0]  %s672_s0, 64, %s15_s7, [#allocation3]  }
  0x11   :  { %529 = dma.done.wait [#allocation3], 64  }
  0x12   :  { %530 = vsyncadd [#allocation3], 4294967232  ;;  %v21_v0 = vld [vmem:[#allocation2] sm:$0xf]  ;;  %s534_s18 = smov 96   ;;  %s535_s19 = smov 32   ;;  %v44_v3 = vlaneseq }
  0x13   :  { %25 = vrot.lane.b32.xlu0 %v21_v0, %s534_s18  ;;  %33 = vrot.lane.b32.xlu1 %v21_v0, %s535_s19  ;;  %s536_s20 = smov 64   ;;  %v537_v1 = vmov 1934713408   ;;  %v538_v6 = vmov 1983009808   ;;  %v23_v10 = vrot.slane %v21_v0, 2 }
  0x14   :  { %v42_v2 = vunpack.c.l.s4 %v537_v1  ;;  %v45_v5 = vshrl.u32 %v44_v3, 7  ;;  %v87_v7 = vunpack.c.l.s4 %v538_v6  ;;  %vm120_vm0 = vcmask 261120   ;;  %s540_s0 = smov [#allocation5]  }
  0x15   :  { %v539_v56 = vmov 0.0   ;;  %vm432_vm5 = vcmask 523264   ;;  %vm434_vm6 = vcmask 785408   ;;  %s457_s21 = sshll.u32 %s540_s0, 4  ;;  %s458_s21 = int_to_ptr.vmem [resolvable:$true] %s457_s21 }
  0x16   :  { %v43_v4 = vunpack.c.0.s8 %v42_v2  ;;  %v88_v15 = vunpack.c.0.s8 %v87_v7  ;;  %s507_s22 = scalar_lea.vmem %s458_s21, 64  ;;  %p512_p9 = scmp.lt.s32.totalorder %s458_s21, %s458_s21 }
  0x17   :  { %29 = vrot.lane.b32.xlu0 %v21_v0, %s536_s20  ;;  %p508_p8 = scmp.ne.s32.totalorder %s458_s21, %s507_s22  ;;  %p513_p10 = scmp.lt.s32.totalorder %s507_s22, %s507_s22 }
  0x18   :  { %v566_v12 = vsub.s32 %v43_v4, %v45_v5  ;;  %v570_v23 = vsub.s32 %v88_v15, %v45_v5 }
  0x19   :  { %p514_p11 = por %p513_p10, %p512_p9 }
  0x1b   :  { %p515_p12 = pnand %p514_p11, %p508_p8 }
  0x85   :  { %v26_v8 = vpop.permute.xlu0 %25  ;;  %v34_v9 = vpop.permute.xlu1 %33 }
  0x86   :  { %v27_v11 = vrot.slane %v26_v8, 2  ;;  %v40_v13 = vcombine.low %v21_v0, %v26_v8  ;;  %v35_v14 = vrot.slane %v34_v9, 2 }
  0x88   :  { %v58_v17 = vcombine.low %v23_v10, %v27_v11  ;;  %v47_v20 = vrot.slane %v40_v13, %v566_v12 }
  0x89   :  { %v30_v16 = vpop.permute.xlu0 %29 }
  0x8a   :  { %v31_v18 = vrot.slane %v30_v16, 2  ;;  %v49_v19 = vcombine.low %v30_v16, %v34_v9  ;;  %v65_v24 = vrot.slane %v58_v17, %v566_v12  ;;  %v48_v57 = vcombine.high %v47_v20, %v539_v56 }
  0x8c   :  { %v56_v21 = vrot.slane %v49_v19, %v566_v12  ;;  %v67_v22 = vcombine.low %v31_v18, %v35_v14  ;;  %v66_v58 = vcombine.high %v65_v24, %v539_v56 }
  0x8e   :  { %v74_v25 = vrot.slane %v67_v22, %v566_v12  ;;  %v84_v26 = vcombine.low %v47_v20, %v56_v21  ;;  %v466_v27 = vcombine.high %v47_v20, %v56_v21  ;;  %v57_v63 = vcombine.high %v56_v21, %v539_v56 }
  0x90   :  { %v85_v28 = vcombine.low %v65_v24, %v74_v25  ;;  %v467_v29 = vcombine.high %v65_v24, %v74_v25  ;;  %v92_v30 = vrot.slane %v84_v26, %v570_v23  ;;  %v109_v32 = vrot.slane %v466_v27, %v570_v23 }
  0x91   :  { %v75_v0 = vcombine.high %v74_v25, %v539_v56 }
  0x92   :  { %v99_v31 = vrot.slane %v85_v28, %v570_v23  ;;  %v116_v33 = vrot.slane %v467_v29, %v570_v23 }
  0x94   :  { %v100_v34 = vcombine.low %v92_v30, %v99_v31  ;;  %v117_v35 = vcombine.low %v109_v32, %v116_v33 }
  0x96   :  { %v121_v36 = vsel %vm120_vm0, %v100_v34, 0.0  ;;  %v128_v37 = vsel %vm120_vm0, %v117_v35, 0.0 }
  0x97   :  { %v122_v38 = vrot.slane %v121_v36, 4  ;;  %v129_v39 = vrot.slane %v128_v37, 4 }
  0x99   :  { %v123_v40 = vadd.f32 %v122_v38, %v121_v36  ;;  %v130_v41 = vadd.f32 %v129_v39, %v128_v37 }
  0x9b   :  { %v124_v42 = vrot.slane %v123_v40, 2  ;;  %v131_v43 = vrot.slane %v130_v41, 2 }
  0x9d   :  { %v125_v44 = vadd.f32 %v124_v42, %v123_v40  ;;  %v132_v45 = vadd.f32 %v131_v43, %v130_v41 }
  0x9f   :  { %v126_v46 = vrot.slane %v125_v44, 1  ;;  %v133_v47 = vrot.slane %v132_v45, 1 }
  0xa1   :  { %v127_v48 = vadd.f32 %v126_v46, %v125_v44  ;;  %v134_v49 = vadd.f32 %v133_v47, %v132_v45 }
  0xa3   :  { %v136_v50 = vmul.f32 0.125, %v127_v48  ;;  %v137_v51 = vmul.f32 0.125, %v134_v49 }
  0xa5   :  { %v140_v52 = vcombine.high %v136_v50, %v136_v50  ;;  %v147_v53 = vrot.slane %v136_v50, %v570_v23  ;;  %v157_v54 = vcombine.high %v137_v51, %v137_v51  ;;  %v164_v55 = vrot.slane %v137_v51, %v570_v23 }
  0xa7   :  { %v154_v59 = vrot.slane %v140_v52, %v570_v23  ;;  %v155_v60 = vcombine.high %v147_v53, %v147_v53  ;;  %v171_v61 = vrot.slane %v157_v54, %v570_v23  ;;  %v172_v62 = vcombine.high %v164_v55, %v164_v55 }
  0xa8   :  { %v588_v1 = vsub.f32 %v47_v20, %v147_v53  ;;  %v590_v2 = vsub.f32 %v48_v57, %v164_v55 }
  0xa9   :  { %v156_v3 = vcombine.high %v154_v59, %v154_v59  ;;  %v173_v4 = vcombine.high %v171_v61, %v171_v61  ;;  %v592_v5 = vsub.f32 %v56_v21, %v155_v60  ;;  %v594_v6 = vsub.f32 %v65_v24, %v154_v59 }
  0xaa   :  { %v596_v7 = vsub.f32 %v57_v63, %v172_v62  ;;  %v598_v8 = vsub.f32 %v66_v58, %v171_v61  ;;  %v190_v13 = vmul.f32 %v588_v1, %v588_v1  ;;  %v194_v16 = vmul.f32 %v590_v2, %v590_v2 }
  0xab   :  { %v600_v9 = vsub.f32 %v74_v25, %v156_v3  ;;  %v602_v10 = vsub.f32 %v75_v0, %v173_v4  ;;  %v191_v11 = vmul.f32 %v592_v5, %v592_v5  ;;  %v192_v14 = vmul.f32 %v594_v6, %v594_v6 }
  0xac   :  { %v195_v15 = vmul.f32 %v596_v7, %v596_v7  ;;  %v196_v18 = vmul.f32 %v598_v8, %v598_v8 }
  0xad   :  { %v193_v17 = vmul.f32 %v600_v9, %v600_v9  ;;  %v197_v19 = vmul.f32 %v602_v10, %v602_v10  ;;  %v206_v20 = vcombine.low %v190_v13, %v191_v11 }
  0xae   :  { %v223_v21 = vcombine.low %v194_v16, %v195_v15 }
  0xaf   :  { %v207_v22 = vcombine.low %v192_v14, %v193_v17  ;;  %v224_v24 = vcombine.low %v196_v18, %v197_v19  ;;  %v214_v27 = vrot.slane %v206_v20, %v570_v23 }
  0xb0   :  { %v231_v28 = vrot.slane %v223_v21, %v570_v23 }
  0xb1   :  { %v221_v25 = vrot.slane %v207_v22, %v570_v23  ;;  %v238_v26 = vrot.slane %v224_v24, %v570_v23 }
  0xb3   :  { %v222_v29 = vcombine.low %v214_v27, %v221_v25  ;;  %v239_v30 = vcombine.low %v231_v28, %v238_v26 }
  0xb5   :  { %v242_v31 = vsel %vm120_vm0, %v222_v29, 0.0  ;;  %v249_v32 = vsel %vm120_vm0, %v239_v30, 0.0 }
  0xb6   :  { %v243_v33 = vrot.slane %v242_v31, 4  ;;  %v250_v34 = vrot.slane %v249_v32, 4 }
  0xb8   :  { %v244_v35 = vadd.f32 %v243_v33, %v242_v31  ;;  %v251_v36 = vadd.f32 %v250_v34, %v249_v32 }
  0xba   :  { %v245_v37 = vrot.slane %v244_v35, 2  ;;  %v252_v38 = vrot.slane %v251_v36, 2 }
  0xbc   :  { %v246_v39 = vadd.f32 %v245_v37, %v244_v35  ;;  %v253_v40 = vadd.f32 %v252_v38, %v251_v36 }
  0xbe   :  { %v247_v41 = vrot.slane %v246_v39, 1  ;;  %v254_v42 = vrot.slane %v253_v40, 1 }
  0xc0   :  { %v248_v43 = vadd.f32 %v247_v41, %v246_v39  ;;  %v255_v44 = vadd.f32 %v254_v42, %v253_v40 }
  0xc2   :  { %v257_v45 = vmul.f32 0.14285715, %v248_v43  ;;  %v258_v46 = vmul.f32 0.14285715, %v255_v44 }
  0xc4   :  { %477 = vrsqrt.f32 %v257_v45  ;;  %vm261_vm1 = vcmp.eq.f32.partialorder %v257_v45, inf  ;;  %v264_v50 = vand.u32 2147483648, %v257_v45  ;;  %vm263_vm2 = vcmp.eq.f32.partialorder %v257_v45, 0.0 }
  0xc5   :  { %479 = vrsqrt.f32 %v258_v46  ;;  %vm268_vm3 = vcmp.eq.f32.partialorder %v258_v46, inf  ;;  %v271_v53 = vand.u32 2147483648, %v258_v46  ;;  %vm270_vm4 = vcmp.eq.f32.partialorder %v258_v46, 0.0 }
  0xce   :  { %v478_v47 = vpop.eup %477 }
  0xcf   :  { %v480_v48 = vpop.eup %479  ;;  %v260_v49 = vmul.f32 %v478_v47, %v257_v45 }
  0xd0   :  { %v267_v51 = vmul.f32 %v480_v48, %v258_v46 }
  0xd1   :  { %v262_v52 = vsel %vm261_vm1, %v257_v45, %v260_v49 }
  0xd2   :  { %v265_v54 = vsel %vm263_vm2, %v264_v50, %v262_v52  ;;  %v269_v55 = vsel %vm268_vm3, %v258_v46, %v267_v51 }
  0xd3   :  { %v272_v57 = vsel %vm270_vm4, %v271_v53, %v269_v55  ;;  %v273_v58 = vadd.f32 1e-08, %v265_v54 }
  0xd4   :  { %v274_v59 = vadd.f32 1e-08, %v272_v57 }
  0xd5   :  { %481 = vrcp.f32 %v273_v58 }
  0xd6   :  { %483 = vrcp.f32 %v274_v59 }
  0xdf   :  { %v482_v60 = vpop.eup %481 }
  0xe0   :  { %v484_v61 = vpop.eup %483  ;;  %v286_v62 = vrot.slane %v482_v60, %v570_v23  ;;  %v279_v63 = vcombine.high %v482_v60, %v482_v60 }
  0xe1   :  { %v303_v0 = vrot.slane %v484_v61, %v570_v23  ;;  %v296_v3 = vcombine.high %v484_v61, %v484_v61 }
  0xe2   :  { %v321_v4 = vmul.f32 %v286_v62, %v588_v1  ;;  %v293_v11 = vrot.slane %v279_v63, %v570_v23  ;;  %v294_v13 = vcombine.high %v286_v62, %v286_v62 }
  0xe3   :  { %v325_v14 = vmul.f32 %v303_v0, %v590_v2  ;;  %v310_v15 = vrot.slane %v296_v3, %v570_v23  ;;  %v311_v16 = vcombine.high %v303_v0, %v303_v0 }
  0xe4   :  { %v323_v17 = vmul.f32 %v293_v11, %v594_v6  ;;  %v322_v18 = vmul.f32 %v294_v13, %v592_v5  ;;  %v295_v19 = vcombine.high %v293_v11, %v293_v11 }
  0xe5   :  { %v329_v20 = vcombine.low %v321_v4, %v325_v14  ;;  %v327_v21 = vmul.f32 %v310_v15, %v598_v8  ;;  %v326_v22 = vmul.f32 %v311_v16, %v596_v7  ;;  %v312_v24 = vcombine.high %v310_v15, %v310_v15 }
  0xe6   :  { %v324_v1 = vmul.f32 %v295_v19, %v600_v9 }
  0xe7   :  { %v336_v25 = vrot.slane %v329_v20, %v566_v12  ;;  %v347_v26 = vcombine.low %v323_v17, %v327_v21  ;;  %v338_v2 = vcombine.low %v322_v18, %v326_v22  ;;  %v328_v27 = vmul.f32 %v312_v24, %v602_v10 }
  0xe9   :  { %v337_v28 = vcombine.high %v336_v25, %v539_v56  ;;  %v354_v6 = vrot.slane %v347_v26, %v566_v12  ;;  %v356_v5 = vcombine.low %v324_v1, %v328_v27  ;;  %v345_v7 = vrot.slane %v338_v2, %v566_v12 }
  0xeb   :  { %v372_v29 = vrot.slane %v337_v28, %v570_v23  ;;  %v355_v8 = vcombine.high %v354_v6, %v539_v56  ;;  %v363_v30 = vrot.slane %v356_v5, %v566_v12  ;;  %v383_v10 = vrot.slane %v345_v7, %v570_v23 }
  0xec   :  { %v346_v31 = vcombine.high %v345_v7, %v539_v56 }
  0xed   :  { %373 = vrot.lane.b32.xlu1 %v372_v29, %s535_s19  ;;  %v405_v9 = vrot.slane %v355_v8, %v570_v23  ;;  %v416_v32 = vrot.slane %v363_v30, %v570_v23  ;;  %v364_v33 = vcombine.high %v363_v30, %v539_v56 }
  0xee   :  { %v394_v34 = vrot.slane %v346_v31, %v570_v23 }
  0xef   :  { %406 = vrot.lane.b32.xlu0 %v405_v9, %s535_s19  ;;  %v427_v12 = vrot.slane %v364_v33, %v570_v23 }
  0xf1   :  { %384 = vrot.lane.b32.xlu1 %v383_v10, %s536_s20 }
  0xf3   :  { %417 = vrot.lane.b32.xlu0 %v416_v32, %s536_s20 }
  0xf5   :  { %395 = vrot.lane.b32.xlu1 %v394_v34, %s534_s18 }
  0xf7   :  { %428 = vrot.lane.b32.xlu0 %v427_v12, %s534_s18 }
 0x15f   :  { %v374_v35 = vpop.permute.xlu1 %373 }
 0x160   :  { %v431_v40 = vsel %vm120_vm0, %v336_v25, %v374_v35 }
 0x161   :  { %v407_v36 = vpop.permute.xlu0 %406 }
 0x162   :  { %v436_v56 = vsel %vm120_vm0, %v354_v6, %v407_v36 }
 0x163   :  { %v385_v37 = vpop.permute.xlu1 %384 }
 0x164   :  { %v433_v41 = vsel %vm432_vm5, %v431_v40, %v385_v37 }
 0x165   :  { %v418_v38 = vpop.permute.xlu0 %417 }
 0x166   :  { %v437_v42 = vsel %vm432_vm5, %v436_v56, %v418_v38 }
 0x167   :  { %v396_v39 = vpop.permute.xlu1 %395 }
 0x168   :  { %v435_v44 = vsel %vm434_vm6, %v433_v41, %v396_v39 }
 0x169   :  { %v429_v43 = vpop.permute.xlu0 %428 }
 0x16a   :  { %v438_v23 = vsel %vm434_vm6, %v437_v42, %v429_v43 }
 0x16b   :  { %v441_v45 = vcombine.low %v435_v44, %v438_v23 }
 0x16d   :  { %468 = vst.sshfl [vmem:[#allocation5] sm:$0x33 pattern:$0x76325410] %v441_v45 }
 0x16e   :  { %518 = shalt.err (!%p515_p12)
}
 0x16f   :  { %s519_s25 = scalar_lea.hbm %s673_s1, 64 }
 0x170   :  { %p520_p13 = scmp.ne.s32.totalorder %s673_s1, %s519_s25  ;;  %p523_p0 = scmp.lt.u32.totalorder %s519_s25, %s673_s1 }
 0x172   :  { %p525_p1 = pnand %p523_p0, %p520_p13 }
 0x174   :  { %528 = shalt.err (!%p525_p1)
}
 0x175   :  { %460 = dma.vmem_to_hbm [thread:$0]  %s458_s21, 64, %s673_s1, [#allocation4]  }
 0x176   :  { %531 = dma.done.wait [#allocation4], 64  }
 0x177   :  { %532 = vsyncadd [#allocation4], 4294967232 }
 0x178   :  { %464 = vsyncpa [#allocation3], 1 }
 0x179   :  { %465 = vsyncpa [#allocation4], 1 }

// kernel: tpu_custom_call.1
= control target key start
LH: loop header
LB: loop body
LE: loop exit
PB: predicated region body
PF: predicated region fallthrough
CT: control target
= control target key end

     0   :  { %6 = vsyncpa [#allocation3], 0  ;;  %s661_s0 = inlined_call_operand.hbm [shape: f32[2,8,32], index: 0, kind: input, shape index: {}]   ;;  %s662_s1 = inlined_call_operand.hbm [shape: f32[2,8,32], index: 1, kind: output, shape index: {}]  }
   0x1   :  { %8 = vsyncpa [#allocation3 + $0x1], 0 }
   0x2   :  { %9 = vsyncpa [#allocation4], 0 }
   0x3   :  { %11 = vsyncpa [#allocation4 + $0x1], 0  ;;  %s482_s6 = smov 0   ;;  %s484_s7 = smov 0  }
   0x4   :  { %s486_s8 = smov 0   ;;  %s488_s9 = smov 0  }
   0x5   :  { %s490_s10 = smov 0   ;;  %s492_s11 = smov 0  }
   0x6 LB: > { %s277_s12 = sadd.s32 4294967295, %s468_s11   ;;  %s278_s13 = sadd.s32 4294967294, %s468_s11   ;;  %s468_s11 = sphi %s492_s11, %s17_s11   ;;  %s464_s10 = sphi %s490_s10, %s678_s10   ;;  %s460_s9 = sphi %s488_s9, %s677_s9   ;;  %s456_s8 = sphi %s486_s8, %s676_s8   ;;  %s452_s7 = sphi %s484_s7, %s675_s7   ;;  %s448_s6 = sphi %s482_s6, %s674_s6  }
   0x7   : > { %s29_s14 = sadd.s32 1, %s464_s10  ;;  %s38_s15 = sadd.s32 1, %s456_s8 }
   0x8   : > { %p31_p0 = scmp.ge.s32.totalorder %s29_s14, 2  ;;  %p45_p1 = scmp.ne.s32.totalorder %s456_s8, %s452_s7 }
   0x9   : > { %p46_p2 = scmp.eq.s32.totalorder %s468_s11, 0  ;;  %p51_p3 = scmp.ne.s32.totalorder %s452_s7, %s448_s6 }
   0xa   : > { %s680_s14 = smov (%p31_p0, %s29_s14), 0  ;;  %p52_p5 = scmp.eq.s32.totalorder %s277_s12, 0 }
   0xb   : > { %p523_p4 = por %p46_p2, %p45_p1  ;;  %s33_s17 = ssub.s32 %s464_s10, %s680_s14 }
   0xc   : > { %p77_p6 = scmp.eq.s32.totalorder %s277_s12, 1  ;;  %p36_p7 = scmp.eq.s32.totalorder %s33_s17, 0 }
   0xd   : > { %p529_p8 = por %p52_p5, %p51_p3  ;;  %p83_p10 = scmp.eq.s32.totalorder %s278_s13, 1 }
   0xe   : > { %p533_p9 = por %p77_p6, %p45_p1  ;;  %p302_p13 = scmp.lt.s32.totalorder %s468_s11, 2 }
   0xf   : > { %s538_s20 = scalar_select %p36_p7, %s456_s8, %s38_s15  }
  0x10   : > { %s666_s19 = scalar_select %p533_p9, 1, 0 }
  0x11   : > { %p540_p11 = por %p83_p10, %p51_p3  ;;  %s103_s22 = sand.u32 1, %s456_s8  }
  0x12   : > { %s281_s23 = sshll.u32 %s103_s22, 3  ;;  %s282_s24 = sshll.u32 %s464_s10, 7 }
  0x13   : > { %s667_s21 = scalar_select %p540_p11, 1, 0 }
  0x14   : > { %s551_s27 = scalar_lea.hbm %s661_s0, %s282_s24  ;;  %s107_s28 = scalar_lea.vmem [#allocation2], %s281_s23 }
  0x15   : > { %s115_s29 = sshll.u32 %s107_s28, 4  ;;  %p557_p0 = pnand %p302_p13, %p523_p4  ;;  %s553_s29 = int_to_ptr.vmem [resolvable:$true] %s115_s29 }
  0x16   : > { %s104_s2 = scalar_lea.sflag [#allocation3], %s103_s22  ;;  %s356_s3 = scalar_lea.hbm %s551_s27, 128 }
  0x17   : > { %p357_p3 = scmp.ne.s32.totalorder %s551_s27, %s356_s3  ;;  %p358_p5 = pneg %p557_p0 }
  0x18   : > { %s361_s12 = scalar_lea.hbm %s661_s0, 256  ;;  %p362_p4 = scmp.lt.u32.totalorder %s551_s27, %s661_s0 }
  0x19   : > { %p359_p6 = pnand %p358_p5, %p357_p3  ;;  %p363_p10 = scmp.lt.u32.totalorder %s361_s12, %s356_s3 }
  0x1a   : > { %p365_p12 = scmp.lt.u32.totalorder %s356_s3, %s551_s27 }
  0x1b   : > { %p360_p7 = pneg %p359_p6  ;;  %p364_p13 = por %p363_p10, %p362_p4 }
  0x1d   : > { %p366_p1 = por %p365_p12, %p364_p13 }
  0x1f   : > { %p367_p2 = pnand %p366_p1, %p360_p7 }
  0x21   : > { %370 = shalt.err (!%p367_p2)
}
  0x22   : > { %s371_s16 = scalar_lea.vmem %s553_s29, 128  ;;  %s470_s17 = smov [#allocation2]  }
  0x23   : > { %p372_p3 = scmp.ne.s32.totalorder %s553_s29, %s371_s16  ;;  %s376_s22 = sshll.u32 %s470_s17, 4  ;;  %s377_s22 = int_to_ptr.vmem [resolvable:$false] %s376_s22 }
  0x24   : > { %s378_s23 = scalar_lea.vmem %s377_s22, 256  ;;  %p379_p9 = scmp.lt.s32.totalorder %s553_s29, %s377_s22 }
  0x25   : > { %p374_p6 = pnand %p372_p3, %p358_p5  ;;  %p380_p4 = scmp.lt.s32.totalorder %s378_s23, %s371_s16 }
  0x27   : > { %p375_p11 = pneg %p374_p6  ;;  %p381_p10 = por %p380_p4, %p379_p9 }
  0x29   : > { %p382_p12 = pnand %p381_p10, %p375_p11 }
  0x2b   : > { %385 = shalt.err (!%p382_p12)
}
  0x2c   : > { %297 = dma.hbm_to_vmem [thread:$0]  (!%p557_p0), %s551_s27, 128, %s553_s29, %s104_s2  }
  0x2d   : > { %p669_p1 = scmp.lt.s32.totalorder %s468_s11, 3  ;;  %p670_p2 = scmp.ge.s32.totalorder %s468_s11, 1 }
  0x2f   : > { %p121_p5 = pnand %p670_p2, %p669_p1 }
  0x30   : > { %s593_s24 = sand.u32 (!%p121_p5), 1, %s452_s7  }
  0x31   : > { %124 = sbr.rel (%p121_p5) target bundleno = 136 (0x88), region = 24  ;;  %s284_s25 = sshll.u32 (!%p121_p5), %s593_s24, 3 }
  0x32   : > { %s127_s26 = scalar_lea.sflag (!%p121_p5), [#allocation3], %s593_s24  ;;  %s130_s28 = scalar_lea.vmem (!%p121_p5), [#allocation2], %s284_s25 }
  0x38   : > { %439 = dma.done.wait (%p529_p8), %s127_s26, 128  }
  0x39   : > { %441 = vsyncadd (%p529_p8), %s127_s26, 4294967168  ;;  %vm150_vm0 = vcmask 261120   ;;  %v149_v0 = vld [vmem:[%s130_s28] sm:$0xff]  ;;  %s148_s18 = scalar_lea.vmem [#allocation5], %s284_s25  ;;  %s287_s29 = sshll.u32 %s460_s9, 7 }
  0x3a   : > { %v151_v1 = vsel %vm150_vm0, %v149_v0, 0.0  ;;  %s197_s27 = sshll.u32 %s148_s18, 4  ;;  %s613_s3 = scalar_lea.hbm %s662_s1, %s287_s29  ;;  %s608_s27 = int_to_ptr.vmem [resolvable:$true] %s197_s27 }
  0x3b   : > { %v152_v2 = vrot.slane %v151_v1, 4  ;;  %s183_s4 = scalar_lea.sflag [#allocation4], %s593_s24  ;;  %s386_s5 = scalar_lea.vmem %s608_s27, 128 }
  0x3c   : > { %p387_p8 = scmp.ne.s32.totalorder %s608_s27, %s386_s5  ;;  %p671_p9 = scmp.ne.s32.totalorder %s666_s19, 0 }
  0x3d   : > { %v153_v3 = vadd.f32 %v152_v2, %v151_v1  ;;  %s471_s9 = smov [#allocation5]  }
  0x3e   : > { %p388_p11 = pnand %p387_p8, %p671_p9  ;;  %s390_s12 = sshll.u32 %s471_s9, 4  ;;  %s391_s12 = int_to_ptr.vmem [resolvable:$false] %s390_s12 }
  0x3f   : > { %v154_v4 = vrot.slane %v153_v3, 2  ;;  %s392_s13 = scalar_lea.vmem %s391_s12, 256  ;;  %p393_p7 = scmp.lt.s32.totalorder %s608_s27, %s391_s12 }
  0x40   : > { %p389_p0 = pneg %p388_p11  ;;  %p394_p13 = scmp.lt.s32.totalorder %s392_s13, %s386_s5 }
  0x41   : > { %v155_v5 = vadd.f32 %v154_v4, %v153_v3 }
  0x42   : > { %p395_p3 = por %p394_p13, %p393_p7 }
  0x43   : > { %v156_v6 = vrot.slane %v155_v5, 1 }
  0x44   : > { %p396_p6 = pnand %p395_p3, %p389_p0 }
  0x45   : > { %v157_v7 = vadd.f32 %v156_v6, %v155_v5 }
  0x47   : > { %v159_v8 = vmul.f32 0.125, %v157_v7 }
  0x49   : > { %v160_v9 = vsub.f32 %v149_v0, %v159_v8 }
  0x4b   : > { %v161_v10 = vmul.f32 %v160_v9, %v160_v9 }
  0x4d   : > { %v162_v11 = vsel %vm150_vm0, %v161_v10, 0.0 }
  0x4e   : > { %v163_v12 = vrot.slane %v162_v11, 4 }
  0x50   : > { %v164_v13 = vadd.f32 %v163_v12, %v162_v11 }
  0x52   : > { %v165_v14 = vrot.slane %v164_v13, 2 }
  0x54   : > { %v166_v15 = vadd.f32 %v165_v14, %v164_v13 }
  0x56   : > { %v167_v16 = vrot.slane %v166_v15, 1 }
  0x58   : > { %v168_v17 = vadd.f32 %v167_v16, %v166_v15 }
  0x5a   : > { %v170_v18 = vmul.f32 0.14285715, %v168_v17 }
  0x5c   : > { %352 = vrsqrt.f32 %v170_v18  ;;  %vm173_vm1 = vcmp.eq.f32.partialorder %v170_v18, inf  ;;  %v176_v20 = vand.u32 2147483648, %v170_v18  ;;  %vm175_vm2 = vcmp.eq.f32.partialorder %v170_v18, 0.0 }
  0x66   : > { %v353_v19 = vpop.eup %352 }
  0x67   : > { %v172_v21 = vmul.f32 %v353_v19, %v170_v18 }
  0x69   : > { %v174_v22 = vsel %vm173_vm1, %v170_v18, %v172_v21 }
  0x6a   : > { %v177_v23 = vsel %vm175_vm2, %v176_v20, %v174_v22 }
  0x6b   : > { %v178_v24 = vadd.f32 1e-08, %v177_v23 }
  0x6d   : > { %354 = vrcp.f32 %v178_v24 }
  0x77   : > { %v355_v25 = vpop.eup %354 }
  0x78   : > { %v180_v26 = vmul.f32 %v355_v25, %v160_v9 }
  0x7a   : > { %181 = vst.msk [vmem:[%s148_s18] sm:$0xff] %vm150_vm0, %v180_v26 }
  0x7b   : > { %399 = shalt.err (!%p396_p6)
}
  0x7c   : > { %s400_s15 = scalar_lea.hbm %s613_s3, 128  ;;  %s404_s22 = scalar_lea.hbm %s662_s1, 256 }
  0x7d   : > { %p401_p4 = scmp.ne.s32.totalorder %s613_s3, %s400_s15  ;;  %p405_p1 = scmp.lt.u32.totalorder %s613_s3, %s662_s1 }
  0x7e   : > { %p406_p2 = scmp.lt.u32.totalorder %s404_s22, %s400_s15  ;;  %p408_p8 = scmp.lt.u32.totalorder %s400_s15, %s613_s3 }
  0x7f   : > { %p402_p10 = pnand %p401_p4, %p671_p9 }
  0x80   : > { %p407_p5 = por %p406_p2, %p405_p1 }
  0x81   : > { %p403_p12 = pneg %p402_p10 }
  0x82   : > { %p409_p11 = por %p408_p8, %p407_p5 }
  0x84   : > { %p410_p0 = pnand %p409_p11, %p403_p12 }
  0x86   : > { %413 = shalt.err (!%p410_p0)
}
  0x87   : > { %292 = dma.vmem_to_hbm [thread:$0]  (%p671_p9), %s608_s27, 128, %s613_s3, %s183_s4  }
  0x88 PF: > { %s209_s25 = sand.u32 1, %s448_s6   ;;  %p672_p7 = scmp.ne.s32.totalorder %s667_s21, 0 }
  0x89   : > { %p673_p13 = scmp.ge.s32.totalorder %s468_s11, 2  ;;  %s210_s26 = scalar_lea.sflag [#allocation4], %s209_s25 }
  0x8b   : > { %p299_p3 = pnand %p673_p13, %p672_p7 }
  0x8d   : > { %443 = dma.done.wait (!%p299_p3), %s210_s26, 128  }
  0x8e   : > { %445 = vsyncadd (!%p299_p3), %s210_s26, 4294967168  ;;  %s17_s11 = sadd.s32 1, %s468_s11   ;;  %s674_s6 = smov %s452_s7 }
  0x8f   : > { %p14_p6 = scmp.ge.s32.totalorder %s17_s11, 4   ;;  %s675_s7 = smov %s456_s8 }
  0x90   : > { %s676_s8 = smov %s538_s20  ;;  %s677_s9 = smov %s464_s10 }
  0x91   : > { %s678_s10 = smov %s680_s14  ;;  %16 = sbr.rel (!%p14_p6) target bundleno = 6 (0x6), region = 69 }
  0x98   :  { %215 = vsyncpa [#allocation3], 1 }
  0x99   :  { %217 = vsyncpa [#allocation3 + $0x1], 1 }
  0x9a   :  { %218 = vsyncpa [#allocation4], 1 }
  0x9b   :  { %220 = vsyncpa [#allocation4 + $0x1], 1 }

</bundles_post_ra>
